<compile_context>
chip_gen: v7x
topology: tpu7x:2x2x1
jax: 0.10.0
libtpu: 0.0.40
codegen_flags: <defaults>
</compile_context>

<pallas_src>
import functools

import jax
import jax.numpy as jnp
from jax.experimental import pallas as pl
from jax.experimental.pallas import tpu as pltpu


def _layernorm2d_kernel(x_ref, w_ref, b_ref, o_ref, *, eps, inv_c):
    # x_ref: (Nb, C, t)   w_ref/b_ref: (1, C, 1)   o_ref: (Nb, C, t)
    x = x_ref[...].astype(jnp.float32)
    # Fused single-pass mean / variance over channels: var = E[x^2] - mu^2.
    mu = jnp.sum(x, axis=1, keepdims=True) * inv_c          # (Nb, 1, t)
    ex2 = jnp.sum(x * x, axis=1, keepdims=True) * inv_c     # (Nb, 1, t)
    var = ex2 - mu * mu
    inv = jax.lax.rsqrt(var + eps)                           # (Nb, 1, t)
    w = w_ref[...].astype(jnp.float32)                       # (1, C, 1)
    b = b_ref[...].astype(jnp.float32)                       # (1, C, 1)
    o_ref[...] = ((x - mu) * inv * w + b).astype(o_ref.dtype)


def _round_up(x, m):
    return ((x + m - 1) // m) * m


def _largest_divisor_leq(n, cap):
    best = 1
    for d in range(1, n + 1):
        if n % d == 0 and d <= cap:
            best = d
    return best


def layernorm2d(x, weight, bias, eps=1e-6):
    """x: (N, C, H, W); weight, bias: (C,). Returns (N, C, H, W)."""
    N, C, H, W = x.shape
    HW = H * W
    dtype_bytes = jnp.dtype(x.dtype).itemsize

    # ---- generation-aware VMEM budget -------------------------------------
    try:
        vmem_cap = int(pltpu.get_tpu_info().vmem_capacity_bytes)
    except Exception:  # pragma: no cover - fallback when info is unavailable
        vmem_cap = 64 << 20
    # ~1/4 of physical VMEM for the (double-buffered in+out) blocks; leaves
    # headroom for f32 intermediates and compiler scratch. 32 MiB on
    # v5e/v6e (128 MiB VMEM), 16 MiB on v7x (64 MiB VMEM).
    block_budget = vmem_cap // 4
    vmem_limit = vmem_cap // 2

    # ---- spatial tile size (multiple of 128, bounded by budget) -----------
    # per-lane cost of a (1, C, t) block:
    #   in + out, double-buffered (4x dtype) + two f32 temps of the tile.
    bytes_per_lane = C * (4 * dtype_bytes + 8)
    t_max = max(128, (block_budget // max(bytes_per_lane, 1)) // 128 * 128)
    t = min(t_max, _round_up(HW, 128))
    HW_pad = _round_up(HW, t)

    # ---- batch blocking when the spatial extent fits in one tile ----------
    n_spatial = HW_pad // t
    if n_spatial == 1 and N > 1:
        nb_cap = max(1, block_budget // max(C * t * (4 * dtype_bytes + 8), 1))
        nb = _largest_divisor_leq(N, nb_cap)
        if nb == N:
            # Keep >= 2 grid iterations along a parallel axis (v7x: 2 TCs).
            nb = _largest_divisor_leq(N, max(1, N // 2))
    else:
        nb = 1

    grid = (N // nb, n_spatial)

    # ---- reshape / pad to lane-dense layout --------------------------------
    x_flat = x.reshape(N, C, HW)
    if HW_pad != HW:
        x_flat = jnp.pad(x_flat, ((0, 0), (0, 0), (0, HW_pad - HW)))
    w3 = weight.reshape(1, C, 1)
    b3 = bias.reshape(1, C, 1)

    cost = pl.CostEstimate(
        flops=6 * N * C * HW,
        transcendentals=N * HW,               # one rsqrt per spatial position
        bytes_accessed=2 * N * C * HW * dtype_bytes + 2 * C * dtype_bytes,
    )

    out_flat = pl.pallas_call(
        functools.partial(_layernorm2d_kernel, eps=float(eps), inv_c=1.0 / C),
        out_shape=jax.ShapeDtypeStruct((N, C, HW_pad), x.dtype),
        grid_spec=pltpu.PrefetchScalarGridSpec(
            num_scalar_prefetch=0,
            grid=grid,
            in_specs=[
                pl.BlockSpec((nb, C, t), lambda n, s: (n, 0, s)),
                pl.BlockSpec((1, C, 1), lambda n, s: (0, 0, 0)),
                pl.BlockSpec((1, C, 1), lambda n, s: (0, 0, 0)),
            ],
            out_specs=pl.BlockSpec((nb, C, t), lambda n, s: (n, 0, s)),
        ),
        compiler_params=pltpu.CompilerParams(
            dimension_semantics=("parallel", "parallel"),
            vmem_limit_bytes=vmem_limit,
        ),
        cost_estimate=cost,
    )(x_flat, w3, b3)

    if HW_pad != HW:
        out_flat = out_flat[:, :, :HW]
    return out_flat.reshape(N, C, H, W)


def _reference(x, weight, bias, eps):
    C = x.shape[1]
    mu = jnp.mean(x, axis=1, keepdims=True)
    var = jnp.mean((x - mu) ** 2, axis=1, keepdims=True)
    return weight.reshape(1, C, 1, 1) * ((x - mu) / jnp.sqrt(var + eps)) \
        + bias.reshape(1, C, 1, 1)


if __name__ == "__main__":
    key = jax.random.PRNGKey(0)
    eps = 1e-6

    # Case 1: HW is a multiple of 128 (no padding path).
    N, C, H, W = 2, 4, 16, 16
    x = jax.random.normal(key, (N, C, H, W), dtype=jnp.float32)
    weight = jnp.ones((C,), dtype=jnp.float32)   # matches torch.ones(channels)
    bias = jnp.zeros((C,), dtype=jnp.float32)    # matches torch.zeros(channels)

    out = jax.block_until_ready(layernorm2d(x, weight, bias, eps))
    ref = _reference(x, weight, bias, eps)
    assert jnp.allclose(out, ref, atol=1e-5, rtol=1e-5), "mismatch vs reference (128-mult HW)"

    # Case 2: HW not a multiple of 128 (exercises lane-padding path).
    H2, W2 = 10, 10
    x2 = jax.random.normal(jax.random.PRNGKey(1), (N, C, H2, W2), dtype=jnp.float32)
    out2 = jax.block_until_ready(layernorm2d(x2, weight, bias, eps))
    ref2 = _reference(x2, weight, bias, eps)
    assert jnp.allclose(out2, ref2, atol=1e-5, rtol=1e-5), "mismatch vs reference (padded HW)"

    print("KERNEL_OK")
</pallas_src>

<mosaic_0001>
module attributes {stable_mosaic.version = 11 : i64} {
  func.func @_layernorm2d_kernel(%arg0: i32, %arg1: i32, %arg2: memref<1x4x256xf32, #tpu.memory_space<vmem>>, %arg3: memref<1x4x1xf32, #tpu.memory_space<vmem>>, %arg4: memref<1x4x1xf32, #tpu.memory_space<vmem>>, %arg5: memref<1x4x256xf32, #tpu.memory_space<vmem>>) attributes {dimension_semantics = [#tpu.dimension_semantics<parallel>, #tpu.dimension_semantics<parallel>], iteration_bounds = array<i64: 2, 1>, scalar_prefetch = 0 : i64, scratch_operands = 0 : i64, tpu.core_type = #tpu.core_type<tc>, window_params = [{transform_indices = @transform_0, window_bounds = array<i64: 1, 4, 256>}, {pipeline_mode = #tpu.pipeline_mode<synchronous>, transform_indices = @transform_1, window_bounds = array<i64: 1, 4, 1>}, {pipeline_mode = #tpu.pipeline_mode<synchronous>, transform_indices = @transform_2, window_bounds = array<i64: 1, 4, 1>}, {transform_indices = @transform_3, window_bounds = array<i64: 1, 4, 256>}]} {
    %c0 = arith.constant 0 : index
    %c0_0 = arith.constant 0 : index
    %c0_1 = arith.constant 0 : index
    %0 = vector.load %arg2[%c0, %c0_0, %c0_1] : memref<1x4x256xf32, #tpu.memory_space<vmem>>, vector<1x4x256xf32>
    %cst = arith.constant dense<0.000000e+00> : vector<1x256xf32>
    %1 = vector.multi_reduction <add>, %0, %cst [1] : vector<1x4x256xf32> to vector<1x256xf32>
    %2 = vector.shape_cast %1 : vector<1x256xf32> to vector<1x1x256xf32>
    %cst_2 = arith.constant 2.500000e-01 : f32
    %3 = vector.broadcast %cst_2 : f32 to vector<1x1x256xf32>
    %4 = arith.mulf %2, %3 : vector<1x1x256xf32>
    %5 = arith.mulf %0, %0 : vector<1x4x256xf32>
    %cst_3 = arith.constant dense<0.000000e+00> : vector<1x256xf32>
    %6 = vector.multi_reduction <add>, %5, %cst_3 [1] : vector<1x4x256xf32> to vector<1x256xf32>
    %7 = vector.shape_cast %6 : vector<1x256xf32> to vector<1x1x256xf32>
    %cst_4 = arith.constant 2.500000e-01 : f32
    %8 = vector.broadcast %cst_4 : f32 to vector<1x1x256xf32>
    %9 = arith.mulf %7, %8 : vector<1x1x256xf32>
    %10 = arith.mulf %4, %4 : vector<1x1x256xf32>
    %11 = arith.subf %9, %10 : vector<1x1x256xf32>
    %cst_5 = arith.constant 9.99999997E-7 : f32
    %12 = vector.broadcast %cst_5 : f32 to vector<1x1x256xf32>
    %13 = arith.addf %11, %12 : vector<1x1x256xf32>
    %14 = math.rsqrt %13 : vector<1x1x256xf32>
    %c0_6 = arith.constant 0 : index
    %c0_7 = arith.constant 0 : index
    %c0_8 = arith.constant 0 : index
    %15 = vector.load %arg3[%c0_6, %c0_7, %c0_8] : memref<1x4x1xf32, #tpu.memory_space<vmem>>, vector<1x4x1xf32>
    %c0_9 = arith.constant 0 : index
    %c0_10 = arith.constant 0 : index
    %c0_11 = arith.constant 0 : index
    %16 = vector.load %arg4[%c0_9, %c0_10, %c0_11] : memref<1x4x1xf32, #tpu.memory_space<vmem>>, vector<1x4x1xf32>
    %17 = vector.broadcast %4 : vector<1x1x256xf32> to vector<1x4x256xf32>
    %18 = arith.subf %0, %17 : vector<1x4x256xf32>
    %19 = vector.broadcast %14 : vector<1x1x256xf32> to vector<1x4x256xf32>
    %20 = arith.mulf %18, %19 : vector<1x4x256xf32>
    %21 = vector.broadcast %15 : vector<1x4x1xf32> to vector<1x4x256xf32>
    %22 = arith.mulf %20, %21 : vector<1x4x256xf32>
    %23 = vector.broadcast %16 : vector<1x4x1xf32> to vector<1x4x256xf32>
    %24 = arith.addf %22, %23 : vector<1x4x256xf32>
    %c0_12 = arith.constant 0 : index
    %c0_13 = arith.constant 0 : index
    %c0_14 = arith.constant 0 : index
    %25 = vector.load %arg5[%c0_12, %c0_13, %c0_14] : memref<1x4x256xf32, #tpu.memory_space<vmem>>, vector<1x4x256xf32>
    tpu.vector_store %arg5[%c0_12, %c0_13, %c0_14], %24 {strides = array<i32>} : memref<1x4x256xf32, #tpu.memory_space<vmem>>, vector<1x4x256xf32>,
    return
  }
  func.func @transform_0(%arg0: i32, %arg1: i32) -> (i32, i32, i32) {
    %c0_i32 = arith.constant 0 : i32
    %c0_i32_0 = arith.constant 0 : i32
    return %arg0, %c0_i32, %arg1 : i32, i32, i32
  }
  func.func @transform_1(%arg0: i32, %arg1: i32) -> (i32, i32, i32) {
    %c0_i32 = arith.constant 0 : i32
    %c0_i32_0 = arith.constant 0 : i32
    %c0_i32_1 = arith.constant 0 : i32
    %c0_i32_2 = arith.constant 0 : i32
    return %c0_i32, %c0_i32_0, %c0_i32_1 : i32, i32, i32
  }
  func.func @transform_2(%arg0: i32, %arg1: i32) -> (i32, i32, i32) {
    %c0_i32 = arith.constant 0 : i32
    %c0_i32_0 = arith.constant 0 : i32
    %c0_i32_1 = arith.constant 0 : i32
    %c0_i32_2 = arith.constant 0 : i32
    return %c0_i32, %c0_i32_0, %c0_i32_1 : i32, i32, i32
  }
  func.func @transform_3(%arg0: i32, %arg1: i32) -> (i32, i32, i32) {
    %c0_i32 = arith.constant 0 : i32
    %c0_i32_0 = arith.constant 0 : i32
    return %arg0, %c0_i32, %arg1 : i32, i32, i32
  }
}

</mosaic_0001>

<bundles_post_ra>
// kernel: tpu_custom_call.1
= control target key start
LH: loop header
LB: loop body
LE: loop exit
PB: predicated region body
PF: predicated region fallthrough
CT: control target
= control target key end

     0   :  { %8 = vsyncpa [#allocation3], 0  ;;  %s803_s0 = inlined_call_operand.hbm [shape: f32[2,4,256], index: 0, kind: input, shape index: {}]   ;;  %s804_s1 = inlined_call_operand.vmem [shape: f32[1,4,1], index: 1, kind: input, shape index: {}]   ;;  %s805_s2 = inlined_call_operand.vmem [shape: f32[1,4,1], index: 2, kind: input, shape index: {}]   ;;  %s806_s3 = inlined_call_operand.hbm [shape: f32[2,4,256], index: 3, kind: output, shape index: {}]  }
   0x1   :  { %10 = vsyncpa [#allocation3 + $0x1], 0 }
   0x2   :  { %11 = vsyncpa [#allocation4], 0 }
   0x3   :  { %13 = vsyncpa [#allocation4 + $0x1], 0  ;;  %s621_s12 = smov 0   ;;  %s623_s13 = smov 0  }
   0x4   :  { %s625_s14 = smov 0   ;;  %s627_s15 = smov 0  }
   0x5   :  { %s629_s16 = smov 0   ;;  %s631_s17 = smov 0  }
   0x6 LB: > { %s396_s18 = sadd.s32 4294967295, %s595_s17   ;;  %s397_s19 = sadd.s32 4294967294, %s595_s17   ;;  %s595_s17 = sphi %s631_s17, %s19_s17   ;;  %s591_s16 = sphi %s629_s16, %s822_s16   ;;  %s587_s15 = sphi %s627_s15, %s821_s15   ;;  %s583_s14 = sphi %s625_s14, %s820_s14   ;;  %s579_s13 = sphi %s623_s13, %s819_s13   ;;  %s575_s12 = sphi %s621_s12, %s818_s12  }
   0x7   : > { %s31_s20 = sadd.s32 1, %s591_s16  ;;  %s40_s21 = sadd.s32 1, %s583_s14 }
   0x8   : > { %p33_p0 = scmp.ge.s32.totalorder %s31_s20, 2  ;;  %p47_p1 = scmp.ne.s32.totalorder %s583_s14, %s579_s13 }
   0x9   : > { %p48_p2 = scmp.eq.s32.totalorder %s595_s17, 0  ;;  %p53_p3 = scmp.ne.s32.totalorder %s579_s13, %s575_s12 }
   0xa   : > { %s824_s20 = smov (%p33_p0, %s31_s20), 0  ;;  %p54_p5 = scmp.eq.s32.totalorder %s396_s18, 0 }
   0xb   : > { %p662_p4 = por %p48_p2, %p47_p1  ;;  %s35_s23 = ssub.s32 %s591_s16, %s824_s20 }
   0xc   : > { %p121_p6 = scmp.eq.s32.totalorder %s396_s18, 1  ;;  %p38_p7 = scmp.eq.s32.totalorder %s35_s23, 0 }
   0xd   : > { %p668_p8 = por %p54_p5, %p53_p3  ;;  %p127_p10 = scmp.eq.s32.totalorder %s397_s19, 1 }
   0xe   : > { %p672_p9 = por %p121_p6, %p47_p1  ;;  %p425_p13 = scmp.lt.s32.totalorder %s595_s17, 2 }
   0xf   : > { %s677_s26 = scalar_select %p38_p7, %s583_s14, %s40_s21  }
  0x10   : > { %s810_s25 = scalar_select %p672_p9, 1, 0 }
  0x11   : > { %p679_p11 = por %p127_p10, %p53_p3  ;;  %s153_s28 = sand.u32 1, %s583_s14  }
  0x12   : > { %s400_s29 = sshll.u32 %s153_s28, 3  ;;  %s411_s30 = sshll.u32 %s591_s16, 7 }
  0x13   : > { %s811_s27 = scalar_select %p679_p11, 1, 0 }
  0x14   : > { %s690_s6 = scalar_lea.hbm %s803_s0, %s411_s30  ;;  %s157_s7 = scalar_lea.vmem [#allocation2], %s400_s29 }
  0x15   : > { %s167_s8 = sshll.u32 %s157_s7, 4  ;;  %p696_p0 = pnand %p425_p13, %p662_p4  ;;  %s692_s8 = int_to_ptr.vmem [resolvable:$true] %s167_s8 }
  0x16   : > { %s154_s10 = scalar_lea.sflag [#allocation3], %s153_s28  ;;  %s483_s11 = scalar_lea.hbm %s690_s6, 128 }
  0x17   : > { %p484_p3 = scmp.ne.s32.totalorder %s690_s6, %s483_s11  ;;  %p485_p5 = pneg %p696_p0 }
  0x18   : > { %s488_s21 = scalar_lea.hbm %s803_s0, 256  ;;  %p489_p4 = scmp.lt.u32.totalorder %s690_s6, %s803_s0 }
  0x19   : > { %p486_p6 = pnand %p485_p5, %p484_p3  ;;  %p490_p10 = scmp.lt.u32.totalorder %s488_s21, %s483_s11 }
  0x1a   : > { %p492_p12 = scmp.lt.u32.totalorder %s483_s11, %s690_s6 }
  0x1b   : > { %p487_p7 = pneg %p486_p6  ;;  %p491_p13 = por %p490_p10, %p489_p4 }
  0x1d   : > { %p493_p1 = por %p492_p12, %p491_p13 }
  0x1f   : > { %p494_p2 = pnand %p493_p1, %p487_p7 }
  0x21   : > { %497 = shalt.err (!%p494_p2)
}
  0x22   : > { %s498_s28 = scalar_lea.vmem %s692_s8, 128  ;;  %s597_s29 = smov [#allocation2]  }
  0x23   : > { %p499_p3 = scmp.ne.s32.totalorder %s692_s8, %s498_s28  ;;  %s503_s30 = sshll.u32 %s597_s29, 4  ;;  %s504_s30 = int_to_ptr.vmem [resolvable:$false] %s503_s30 }
  0x24   : > { %s505_s4 = scalar_lea.vmem %s504_s30, 256  ;;  %p506_p9 = scmp.lt.s32.totalorder %s692_s8, %s504_s30 }
  0x25   : > { %p501_p6 = pnand %p499_p3, %p485_p5  ;;  %p507_p4 = scmp.lt.s32.totalorder %s505_s4, %s498_s28 }
  0x27   : > { %p502_p11 = pneg %p501_p6  ;;  %p508_p10 = por %p507_p4, %p506_p9 }
  0x29   : > { %p509_p12 = pnand %p508_p10, %p502_p11 }
  0x2b   : > { %512 = shalt.err (!%p509_p12)
}
  0x2c   : > { %420 = dma.hbm_to_vmem [thread:$0]  (!%p696_p0), %s690_s6, 128, %s692_s8, %s154_s10  }
  0x2d   : > { %p813_p1 = scmp.lt.s32.totalorder %s595_s17, 3  ;;  %p814_p2 = scmp.ge.s32.totalorder %s595_s17, 1 }
  0x2f   : > { %p173_p5 = pnand %p814_p2, %p813_p1 }
  0x30   : > { %s732_s5 = sand.u32 (!%p173_p5), 1, %s579_s13  }
  0x31   : > { %176 = sbr.rel (%p173_p5) target bundleno = 209 (0xd1), region = 32  ;;  %s404_s7 = sshll.u32 (!%p173_p5), %s732_s5, 3 }
  0x32   : > { %s179_s11 = scalar_lea.sflag (!%p173_p5), [#allocation3], %s732_s5  ;;  %s182_s9 = scalar_lea.vmem (!%p173_p5), [#allocation2], %s404_s7 }
  0x38   : > { %566 = dma.done.wait (%p668_p8), %s179_s11, 128  }
  0x39   : > { %568 = vsyncadd (%p668_p8), %s179_s11, 4294967168  ;;  %v598_v0 = vmov 0   ;;  %v256_v1 = vld [vmem:[%s804_s1] sm:$0xf]  ;;  %vm211_vm0 = vcmask 1043456   ;;  %v275_v47 = vlaneseq  ;;  %s412_s24 = sshll.u32 %s587_s15, 7 }
  0x3a   : > { %477 = vset.pattern.permute.xlu0 %v598_v0  ;;  %v257_v2 = vld [vmem:[%s805_s2] sm:$0xf]  ;;  %v599_v45 = vmov 839922192   ;;  %s204_s19 = scalar_lea.vmem [#allocation5], %s404_s7  ;;  %s754_s28 = scalar_lea.hbm %s806_s3, %s412_s24 }
  0x3b   : > { %270 = vperm.xlu0 %477, %v256_v1   ;;  %v207_v3 = vld [vmem:[%s182_s9] sm:$0xff]  ;;  %v273_v46 = vunpack.c.l.s4 %v599_v45  ;;  %v276_v50 = vshrl.u32 %v275_v47, 7  ;;  %s312_s21 = sshll.u32 %s204_s19, 4  ;;  %s296_s29 = scalar_lea.sflag [#allocation4], %s732_s5  ;;  %s756_s21 = int_to_ptr.vmem [resolvable:$true] %s312_s21 }
  0x3c   : > { %v209_v4 = vcombine.high %v207_v3, %v207_v3  ;;  %v228_v5 = vmul.f32 %v207_v3, %v207_v3  ;;  %v212_v6 = vsel %vm211_vm0, %v207_v3, 0.0  ;;  %s513_s30 = scalar_lea.vmem %s756_s21, 128  ;;  %p815_p9 = scmp.ne.s32.totalorder %s810_s25, 0 }
  0x3d   : > { %v213_v9 = vrot.slane %v212_v6, 4  ;;  %v274_v49 = vunpack.c.0.s8 %v273_v46  ;;  %p514_p8 = scmp.ne.s32.totalorder %s756_s21, %s513_s30  ;;  %s600_s15 = smov [#allocation5]  }
  0x3e   : > { %v219_v7 = vsel %vm211_vm0, %v209_v4, 0.0  ;;  %v230_v8 = vcombine.high %v228_v5, %v228_v5  ;;  %v232_v11 = vsel %vm211_vm0, %v228_v5, 0.0  ;;  %s517_s4 = sshll.u32 %s600_s15, 4  ;;  %s518_s4 = int_to_ptr.vmem [resolvable:$false] %s517_s4 }
  0x3f   : > { %283 = vperm.xlu0 %477, %v257_v2   ;;  %v220_v10 = vrot.slane %v219_v7, 4  ;;  %v214_v13 = vadd.f32 %v213_v9, %v212_v6  ;;  %v233_v14 = vrot.slane %v232_v11, 4  ;;  %v277_v53 = vsub.s32 %v274_v49, %v276_v50  ;;  %p515_p11 = pnand %p514_p8, %p815_p9  ;;  %s519_s7 = scalar_lea.vmem %s518_s4, 256 }
  0x40   : > { %v239_v12 = vsel %vm211_vm0, %v230_v8, 0.0  ;;  %p520_p7 = scmp.lt.s32.totalorder %s756_s21, %s518_s4  ;;  %p521_p13 = scmp.lt.s32.totalorder %s519_s7, %s513_s30 }
  0x41   : > { %v221_v15 = vadd.f32 %v220_v10, %v219_v7  ;;  %v240_v16 = vrot.slane %v239_v12, 4  ;;  %v215_v17 = vrot.slane %v214_v13, 2  ;;  %v234_v18 = vadd.f32 %v233_v14, %v232_v11  ;;  %p516_p0 = pneg %p515_p11 }
  0x42   : > { %p522_p3 = por %p521_p13, %p520_p7 }
  0x43   : > { %v222_v19 = vrot.slane %v221_v15, 2  ;;  %v241_v20 = vadd.f32 %v240_v16, %v239_v12  ;;  %v216_v21 = vadd.f32 %v215_v17, %v214_v13  ;;  %v235_v22 = vrot.slane %v234_v18, 2 }
  0x44   : > { %p523_p6 = pnand %p522_p3, %p516_p0 }
  0x45   : > { %v223_v23 = vadd.f32 %v222_v19, %v221_v15  ;;  %v242_v24 = vrot.slane %v241_v20, 2  ;;  %v217_v25 = vrot.slane %v216_v21, 1  ;;  %v236_v26 = vadd.f32 %v235_v22, %v234_v18 }
  0x47   : > { %v224_v27 = vrot.slane %v223_v23, 1  ;;  %v243_v28 = vadd.f32 %v242_v24, %v241_v20  ;;  %v218_v29 = vadd.f32 %v217_v25, %v216_v21  ;;  %v237_v30 = vrot.slane %v236_v26, 1 }
  0x49   : > { %v225_v31 = vadd.f32 %v224_v27, %v223_v23  ;;  %v244_v32 = vrot.slane %v243_v28, 1  ;;  %v226_v33 = vmul.f32 0.25, %v218_v29  ;;  %v238_v34 = vadd.f32 %v237_v30, %v236_v26 }
  0x4b   : > { %v227_v35 = vmul.f32 0.25, %v225_v31  ;;  %v245_v36 = vadd.f32 %v244_v32, %v243_v28  ;;  %v246_v37 = vmul.f32 0.25, %v238_v34  ;;  %v248_v38 = vmul.f32 %v226_v33, %v226_v33 }
  0x4d   : > { %v247_v39 = vmul.f32 0.25, %v245_v36  ;;  %v249_v40 = vmul.f32 %v227_v35, %v227_v35  ;;  %v250_v41 = vsub.f32 %v246_v37, %v248_v38  ;;  %v260_v51 = vcombine.low %v226_v33, %v227_v35 }
  0x4f   : > { %v251_v42 = vsub.f32 %v247_v39, %v249_v40  ;;  %v252_v43 = vadd.f32 1e-06, %v250_v41  ;;  %v262_v54 = vsub.f32 %v207_v3, %v260_v51 }
  0x51   : > { %v253_v44 = vadd.f32 1e-06, %v251_v42  ;;  %479 = vrsqrt.f32 %v252_v43 }
  0x53   : > { %481 = vrsqrt.f32 %v253_v44 }
  0x5b   : > { %v480_v48 = vpop.eup %479 }
  0x5d   : > { %v482_v52 = vpop.eup %481 }
  0x5e   : > { %v265_v55 = vcombine.low %v480_v48, %v482_v52 }
  0x60   : > { %v267_v57 = vmul.f32 %v265_v55, %v262_v54 }
  0xba   : > { %v271_v56 = vpop.permute.xlu0 %270 }
  0xbb   : > { %v278_v58 = vrot.slane %v271_v56, %v277_v53 }
  0xbd   : > { %v280_v60 = vmul.f32 %v278_v58, %v267_v57 }
  0xbe   : > { %v284_v59 = vpop.permute.xlu0 %283 }
  0xbf   : > { %v291_v61 = vrot.slane %v284_v59, %v277_v53 }
  0xc1   : > { %v293_v62 = vadd.f32 %v291_v61, %v280_v60 }
  0xc3   : > { %294 = vst [vmem:[%s204_s19] sm:$0xff] %v293_v62 }
  0xc4   : > { %526 = shalt.err (!%p523_p6)
}
  0xc5   : > { %s527_s5 = scalar_lea.hbm %s754_s28, 128  ;;  %s531_s6 = scalar_lea.hbm %s806_s3, 256 }
  0xc6   : > { %p528_p4 = scmp.ne.s32.totalorder %s754_s28, %s527_s5  ;;  %p532_p1 = scmp.lt.u32.totalorder %s754_s28, %s806_s3 }
  0xc7   : > { %p533_p2 = scmp.lt.u32.totalorder %s531_s6, %s527_s5  ;;  %p535_p8 = scmp.lt.u32.totalorder %s527_s5, %s754_s28 }
  0xc8   : > { %p529_p10 = pnand %p528_p4, %p815_p9 }
  0xc9   : > { %p534_p5 = por %p533_p2, %p532_p1 }
  0xca   : > { %p530_p12 = pneg %p529_p10 }
  0xcb   : > { %p536_p11 = por %p535_p8, %p534_p5 }
  0xcd   : > { %p537_p0 = pnand %p536_p11, %p530_p12 }
  0xcf   : > { %540 = shalt.err (!%p537_p0)
}
  0xd0   : > { %415 = dma.vmem_to_hbm [thread:$0]  (%p815_p9), %s756_s21, 128, %s754_s28, %s296_s29  }
  0xd1 PF: > { %s324_s18 = sand.u32 1, %s575_s12   ;;  %p816_p7 = scmp.ne.s32.totalorder %s811_s27, 0 }
  0xd2   : > { %p817_p13 = scmp.ge.s32.totalorder %s595_s17, 2  ;;  %s325_s24 = scalar_lea.sflag [#allocation4], %s324_s18 }
  0xd4   : > { %p422_p3 = pnand %p817_p13, %p816_p7 }
  0xd6   : > { %570 = dma.done.wait (!%p422_p3), %s325_s24, 128  }
  0xd7   : > { %572 = vsyncadd (!%p422_p3), %s325_s24, 4294967168  ;;  %s19_s17 = sadd.s32 1, %s595_s17   ;;  %s818_s12 = smov %s579_s13 }
  0xd8   : > { %p16_p6 = scmp.ge.s32.totalorder %s19_s17, 4   ;;  %s819_s13 = smov %s583_s14 }
  0xd9   : > { %s820_s14 = smov %s677_s26  ;;  %s821_s15 = smov %s591_s16 }
  0xda   : > { %s822_s16 = smov %s824_s20  ;;  %18 = sbr.rel (!%p16_p6) target bundleno = 6 (0x6), region = 77 }
  0xe1   :  { %330 = vsyncpa [#allocation3], 1 }
  0xe2   :  { %332 = vsyncpa [#allocation3 + $0x1], 1 }
  0xe3   :  { %333 = vsyncpa [#allocation4], 1 }
  0xe4   :  { %335 = vsyncpa [#allocation4 + $0x1], 1 }

</bundles_post_ra>
